<compile_context>
chip_gen: v5e
topology: v5e:2x2
jax: 0.10.0
libtpu: 0.0.40
codegen_flags: <defaults>
</compile_context>

<pallas_src>
import functools
import math

import jax
import jax.numpy as jnp
from jax.experimental import pallas as pl
from jax.experimental.pallas import tpu as pltpu


# ----------------------------------------------------------------------------
# Kernel
# ----------------------------------------------------------------------------
def _mlp_kernel(num_layers, x_ref, *refs):
    """refs = (w0, b0, w1, b1, ..., w_{L-1}, b_{L-1}, o_ref); all VMEM tiles."""
    o_ref = refs[-1]
    params = refs[:-1]

    h = x_ref[...]  # streamed row tile in its native dtype (f32 or bf16)
    for i in range(num_layers):
        w = params[2 * i][...]          # resident (packed / lane-padded) weight
        b = params[2 * i + 1][...]      # resident bias, (1, out)
        # MXU consumes the native dtype (bf16/f32) and accumulates in f32.
        h = jnp.dot(h.astype(w.dtype), w, preferred_element_type=jnp.float32)
        h = h + b.astype(jnp.float32)   # bias add / ReLU stay on the f32 accumulator
        if i < num_layers - 1:          # ReLU on all but last layer
            h = jnp.maximum(h, 0.0)
            # Fuse the next layer's operand cast into the epilogue so the live
            # intermediate is carried at the (possibly narrower) weight dtype.
            h = h.astype(params[2 * (i + 1)].dtype)
    o_ref[...] = h.astype(o_ref.dtype)


# ----------------------------------------------------------------------------
# Helpers
# ----------------------------------------------------------------------------
def _round_up(a, m):
    return ((a + m - 1) // m) * m


def _cdiv(a, b):
    return -(-a // b)


def _choose_pack(dims, n_rows, itemsize, max_packed_weight_bytes=4 * 1024 * 1024):
    """Rows folded per 128-lane group so every feature axis becomes a multiple of 128."""
    g = 128
    for d in dims:
        g = math.gcd(g, d)
    pack = 128 // g
    if pack == 1:
        return 1
    if n_rows % pack:
        return 1  # packed row-fold needs pack | n_rows; fall back to lane-padded weights
    # Keep block-diagonal weights comfortably VMEM-resident on all generations.
    for din, dout in zip(dims[:-1], dims[1:]):
        if pack * din * pack * dout * itemsize > max_packed_weight_bytes:
            return 1
    return pack


def _pick_vmem_limit_bytes():
    """Per-generation scoped-VMEM limit: ~48 MiB on v7x (64 MiB physical per TC),
    96 MiB on v5e/v6e (128 MiB physical), conservative 32 MiB fallback."""
    try:
        phys = int(pltpu.get_tpu_info().vmem_capacity_bytes)
    except Exception:
        phys = 0
    if not phys:
        return 32 * 1024 * 1024
    return int(min(max(phys - 16 * 1024 * 1024, 32 * 1024 * 1024), 96 * 1024 * 1024))


def _resident_spec(shape, single_buffered):
    """Whole-array VMEM-resident operand (constant index map).  A revisited block is
    never re-streamed, so single-buffering it halves the VMEM it holds."""
    index_map = lambda i: (0,) * len(shape)
    if single_buffered:
        try:
            return pl.BlockSpec(tuple(shape), index_map, pipeline_mode=pl.Buffered(1))
        except TypeError:  # older jax without BlockSpec pipeline_mode
            pass
    return pl.BlockSpec(tuple(shape), index_map)


# ----------------------------------------------------------------------------
# Wrapper
# ----------------------------------------------------------------------------
def mlp_forward(x, weights, biases, *, tile_rows=1024):
    """Fused Pallas MLP.  weights[i]: (in_i, out_i) (= PyTorch W.T), biases[i]: (1, out_i)."""
    orig_shape = x.shape
    in_dim = int(orig_shape[-1])
    num_layers = len(weights)
    out_dim = int(weights[-1].shape[1])
    dims = [in_dim] + [int(w.shape[1]) for w in weights]

    x2 = x.reshape(-1, in_dim)
    n_rows = int(x2.shape[0])
    x_itemsize = jnp.dtype(x.dtype).itemsize
    w_itemsize = jnp.dtype(weights[0].dtype).itemsize

    # ---- lane layout: row folding (pack) or host-side weight lane-padding --------
    # NOTE: in production, pre-pack/pad the weights once outside the step function.
    pack = _choose_pack(dims, n_rows, w_itemsize)
    if pack > 1:
        weights = [jnp.kron(jnp.eye(pack, dtype=w.dtype), w) for w in weights]
        biases = [jnp.tile(b, (1, pack)) for b in biases]
        kdims = [pack * d for d in dims]
    else:
        # Lane-pad hidden/output dims to multiples of 128 so intermediates and the
        # output stay lane-dense (unmasked vst).  x's feature dim is left untouched
        # (full-dim block is legal), so x is never copied.
        kdims = [dims[0]] + [_round_up(d, 128) for d in dims[1:]]
        weights = [jnp.pad(w, ((0, kdims[i] - int(w.shape[0])),
                               (0, kdims[i + 1] - int(w.shape[1]))))
                   for i, w in enumerate(weights)]
        biases = [jnp.pad(b, ((0, 0), (0, kdims[i + 1] - int(b.shape[1]))))
                  for i, b in enumerate(biases)]
    p_in, p_out = kdims[0], kdims[-1]

    param_bytes = sum(int(a.size) * jnp.dtype(a.dtype).itemsize
                      for a in (*weights, *biases))

    # ---- VMEM budget (per generation) and row-tile sizing -------------------------
    vmem_limit = _pick_vmem_limit_bytes()
    budget = vmem_limit - 6 * 1024 * 1024          # headroom for compiler scratch
    max_kdim = max(kdims)
    tile_r = max(8, _round_up(int(tile_rows), 8))
    while tile_r > 8:
        stream = 2 * tile_r * (p_in + p_out) * x_itemsize   # double-buffered x/out tiles
        interm = 2 * tile_r * max_kdim * 4                  # live f32 accumulator + operand
        if stream + interm + param_bytes <= budget:
            break
        tile_r //= 2
    tile_r = max(8, _round_up(tile_r, 8))
    # NOTE: if param_bytes alone exceeds the budget the sizer bottoms out at 8 rows;
    # params are never tiled here, so extremely wide layers would need a K/N-tiled
    # variant (single-buffered params make this far less likely to trigger).

    n_packed = _cdiv(n_rows, pack)                 # exact when pack > 1 (pack | n_rows)
    steps = max(1, _cdiv(n_packed, tile_r))
    if steps == 1:
        tile_r = n_packed                          # full-row block: legal for any count, no pad
    else:
        if steps % 2:
            steps += 1                             # even split over v7x's two TensorCores
        # Prefer an exact tiling (no row padding -> no extra HBM pass over x).
        exact = [s for s in range(steps, steps + 17)
                 if n_packed % s == 0 and (n_packed // s) % 8 == 0
                 and n_packed // s <= tile_r]
        if exact:
            even = [s for s in exact if s % 2 == 0]
            steps = (even or exact)[0]
            tile_r = n_packed // steps
        else:
            tile_r = max(8, _round_up(_cdiv(n_packed, steps), 8))

    r_pad = steps * tile_r
    xp = x2.reshape(n_packed, p_in)                # row-major => free reshape
    if r_pad != n_packed:
        # Rare path (multi-tile input whose packed row count has no exact 8-aligned
        # tiling): zero-pad rows.  This is the only case that copies x in HBM.
        xp = jnp.pad(xp, ((0, r_pad - n_packed), (0, 0)))

    flops = 2 * r_pad * sum(kdims[i] * kdims[i + 1] for i in range(num_layers))
    cost = pl.CostEstimate(
        flops=int(flops),
        transcendentals=0,
        bytes_accessed=int(r_pad * (p_in + p_out) * x_itemsize + param_bytes),
    )

    def run(single_buffered_params):
        in_specs = [pl.BlockSpec((tile_r, p_in), lambda i: (i, 0))]
        flat_params = []
        for w, b in zip(weights, biases):
            in_specs.append(_resident_spec(w.shape, single_buffered_params))
            in_specs.append(_resident_spec(b.shape, single_buffered_params))
            flat_params.extend([w, b])
        out_spec = pl.BlockSpec((tile_r, p_out), lambda i: (i, 0))   # lane-dense output
        return pl.pallas_call(
            functools.partial(_mlp_kernel, num_layers),
            out_shape=jax.ShapeDtypeStruct((r_pad, p_out), x.dtype),
            grid=(steps,),
            in_specs=in_specs,
            out_specs=out_spec,
            compiler_params=pltpu.CompilerParams(
                dimension_semantics=("parallel",),
                vmem_limit_bytes=vmem_limit,
            ),
            cost_estimate=cost,
        )(xp, *flat_params)

    try:
        out = run(True)
    except Exception:
        # Fallback if this jax build rejects Buffered(1) on the resident params.
        out = run(False)

    out = out.reshape(r_pad * pack, p_out // pack)   # free row-major reshape
    out = out[:n_rows]
    if p_out // pack != out_dim:
        out = out[:, :out_dim]                       # drop lane padding (pack==1 fallback)
    return out.reshape(*orig_shape[:-1], out_dim)


# ----------------------------------------------------------------------------
# Parameters / reference
# ----------------------------------------------------------------------------
def init_mlp_params(key, input_dim, hidden_dim, output_dim, num_layers, dtype=jnp.float32):
    """Deterministic synthetic parameters matching the nn.Linear chain shapes."""
    h = [hidden_dim] * (num_layers - 1)
    dims_in = [input_dim] + h
    dims_out = h + [output_dim]
    weights, biases = [], []
    for n, k in zip(dims_in, dims_out):
        key, kw, kb = jax.random.split(key, 3)
        weights.append((jax.random.normal(kw, (n, k), dtype) * 0.05).astype(dtype))  # (in, out) == W.T
        biases.append((jax.random.normal(kb, (1, k), dtype) * 0.05).astype(dtype))
    return weights, biases


def mlp_reference(x, weights, biases):
    """Plain-JAX reference matching the PyTorch forward."""
    num_layers = len(weights)
    h = x
    for i, (w, b) in enumerate(zip(weights, biases)):
        h = h @ w + b[0]
        if i < num_layers - 1:
            h = jnp.maximum(h, 0.0)
    return h


if __name__ == "__main__":
    # Module config consistent with the MLP head usage.
    input_dim, hidden_dim, output_dim, num_layers = 16, 32, 16, 3
    batch, seq = 2, 8  # x: (2, 8, 16)

    key = jax.random.PRNGKey(0)
    key, kx = jax.random.split(key)
    x = jax.random.normal(kx, (batch, seq, input_dim), jnp.float32)
    weights, biases = init_mlp_params(key, input_dim, hidden_dim, output_dim, num_layers)

    # 1) Small input: packed (pack=8) single-tile path, zero row padding of x.
    out = jax.block_until_ready(mlp_forward(x, weights, biases))
    ref = mlp_reference(x, weights, biases)
    assert out.shape == (batch, seq, output_dim), out.shape
    assert jnp.allclose(out, ref, atol=1e-4, rtol=1e-4), "mismatch vs reference"

    # 2) Row count not divisible by the pack factor: lane-padded-weight fallback,
    #    multi-step grid (tile_rows=8) and the rare row-pad path.
    key, kx2 = jax.random.split(key)
    x_odd = jax.random.normal(kx2, (3, 37, input_dim), jnp.float32)
    out2 = jax.block_until_ready(mlp_forward(x_odd, weights, biases, tile_rows=8))
    ref2 = mlp_reference(x_odd, weights, biases)
    assert out2.shape == (3, 37, output_dim), out2.shape
    assert jnp.allclose(out2, ref2, atol=1e-4, rtol=1e-4), "mismatch vs reference (odd rows)"

    # 3) Larger input: multi-step packed path with an exact, even tiling (no padding;
    #    v7x splits the "parallel" row grid over both TensorCores).
    key, kx3 = jax.random.split(key)
    x_big = jax.random.normal(kx3, (4, 512, input_dim), jnp.float32)
    out3 = jax.block_until_ready(mlp_forward(x_big, weights, biases, tile_rows=64))
    ref3 = mlp_reference(x_big, weights, biases)
    assert out3.shape == (4, 512, output_dim), out3.shape
    assert jnp.allclose(out3, ref3, atol=1e-4, rtol=1e-4), "mismatch vs reference (multi-step)"

    # 4) bf16 streaming of x / weights / output (halves HBM traffic); epilogue stays f32.
    x_bf = x.astype(jnp.bfloat16)
    w_bf = [w.astype(jnp.bfloat16) for w in weights]
    b_bf = [b.astype(jnp.bfloat16) for b in biases]
    out4 = jax.block_until_ready(mlp_forward(x_bf, w_bf, b_bf))
    ref4 = mlp_reference(x_bf.astype(jnp.float32),
                         [w.astype(jnp.float32) for w in w_bf],
                         [b.astype(jnp.float32) for b in b_bf])
    assert out4.shape == (batch, seq, output_dim), out4.shape
    assert jnp.allclose(out4.astype(jnp.float32), ref4, atol=3e-2, rtol=3e-2), "mismatch (bf16)"

    print("KERNEL_OK")
</pallas_src>

<mosaic_0001>
module attributes {stable_mosaic.version = 11 : i64} {
  func.func @_mlp_kernel(%arg0: i32, %arg1: memref<2x128xf32, #tpu.memory_space<vmem>>, %arg2: memref<128x256xf32, #tpu.memory_space<vmem>>, %arg3: memref<1x256xf32, #tpu.memory_space<vmem>>, %arg4: memref<256x256xf32, #tpu.memory_space<vmem>>, %arg5: memref<1x256xf32, #tpu.memory_space<vmem>>, %arg6: memref<256x128xf32, #tpu.memory_space<vmem>>, %arg7: memref<1x128xf32, #tpu.memory_space<vmem>>, %arg8: memref<2x128xf32, #tpu.memory_space<vmem>>) attributes {dimension_semantics = [#tpu.dimension_semantics<parallel>], iteration_bounds = array<i64: 1>, scalar_prefetch = 0 : i64, scratch_operands = 0 : i64, tpu.core_type = #tpu.core_type<tc>, window_params = [{transform_indices = @transform_0, window_bounds = array<i64: 2, 128>}, {pipeline_mode = #tpu.pipeline_mode<synchronous>, transform_indices = @transform_1, window_bounds = array<i64: 128, 256>}, {pipeline_mode = #tpu.pipeline_mode<synchronous>, transform_indices = @transform_2, window_bounds = array<i64: 1, 256>}, {pipeline_mode = #tpu.pipeline_mode<synchronous>, transform_indices = @transform_3, window_bounds = array<i64: 256, 256>}, {pipeline_mode = #tpu.pipeline_mode<synchronous>, transform_indices = @transform_4, window_bounds = array<i64: 1, 256>}, {pipeline_mode = #tpu.pipeline_mode<synchronous>, transform_indices = @transform_5, window_bounds = array<i64: 256, 128>}, {pipeline_mode = #tpu.pipeline_mode<synchronous>, transform_indices = @transform_6, window_bounds = array<i64: 1, 128>}, {transform_indices = @transform_7, window_bounds = array<i64: 2, 128>}]} {
    %c0 = arith.constant 0 : index
    %c0_0 = arith.constant 0 : index
    %0 = vector.load %arg1[%c0, %c0_0] : memref<2x128xf32, #tpu.memory_space<vmem>>, vector<2x128xf32>
    %c0_1 = arith.constant 0 : index
    %c0_2 = arith.constant 0 : index
    %1 = vector.load %arg2[%c0_1, %c0_2] : memref<128x256xf32, #tpu.memory_space<vmem>>, vector<128x256xf32>
    %c0_3 = arith.constant 0 : index
    %c0_4 = arith.constant 0 : index
    %2 = vector.load %arg3[%c0_3, %c0_4] : memref<1x256xf32, #tpu.memory_space<vmem>>, vector<1x256xf32>
    %cst = arith.constant dense<0.000000e+00> : vector<2x256xf32>
    %3 = tpu.matmul %0, %1, %cst {dimension_numbers = #tpu.dot_dimension_numbers<[1], [0], [0], [1], [0, 0, 1, 1], [], []>} : vector<2x128xf32>, vector<128x256xf32>, vector<2x256xf32> -> vector<2x256xf32>
    %4 = vector.broadcast %2 : vector<1x256xf32> to vector<2x256xf32>
    %5 = arith.addf %3, %4 : vector<2x256xf32>
    %cst_5 = arith.constant 0.000000e+00 : f32
    %6 = vector.broadcast %cst_5 : f32 to vector<2x256xf32>
    %7 = arith.maximumf %5, %6 : vector<2x256xf32>
    %c0_6 = arith.constant 0 : index
    %c0_7 = arith.constant 0 : index
    %8 = vector.load %arg4[%c0_6, %c0_7] : memref<256x256xf32, #tpu.memory_space<vmem>>, vector<256x256xf32>
    %c0_8 = arith.constant 0 : index
    %c0_9 = arith.constant 0 : index
    %9 = vector.load %arg5[%c0_8, %c0_9] : memref<1x256xf32, #tpu.memory_space<vmem>>, vector<1x256xf32>
    %cst_10 = arith.constant dense<0.000000e+00> : vector<2x256xf32>
    %10 = tpu.matmul %7, %8, %cst_10 {dimension_numbers = #tpu.dot_dimension_numbers<[1], [0], [0], [1], [0, 0, 1, 1], [], []>} : vector<2x256xf32>, vector<256x256xf32>, vector<2x256xf32> -> vector<2x256xf32>
    %11 = vector.broadcast %9 : vector<1x256xf32> to vector<2x256xf32>
    %12 = arith.addf %10, %11 : vector<2x256xf32>
    %cst_11 = arith.constant 0.000000e+00 : f32
    %13 = vector.broadcast %cst_11 : f32 to vector<2x256xf32>
    %14 = arith.maximumf %12, %13 : vector<2x256xf32>
    %c0_12 = arith.constant 0 : index
    %c0_13 = arith.constant 0 : index
    %15 = vector.load %arg6[%c0_12, %c0_13] : memref<256x128xf32, #tpu.memory_space<vmem>>, vector<256x128xf32>
    %c0_14 = arith.constant 0 : index
    %c0_15 = arith.constant 0 : index
    %16 = vector.load %arg7[%c0_14, %c0_15] : memref<1x128xf32, #tpu.memory_space<vmem>>, vector<1x128xf32>
    %cst_16 = arith.constant dense<0.000000e+00> : vector<2x128xf32>
    %17 = tpu.matmul %14, %15, %cst_16 {dimension_numbers = #tpu.dot_dimension_numbers<[1], [0], [0], [1], [0, 0, 1, 1], [], []>} : vector<2x256xf32>, vector<256x128xf32>, vector<2x128xf32> -> vector<2x128xf32>
    %18 = vector.broadcast %16 : vector<1x128xf32> to vector<2x128xf32>
    %19 = arith.addf %17, %18 : vector<2x128xf32>
    %c0_17 = arith.constant 0 : index
    %c0_18 = arith.constant 0 : index
    %20 = vector.load %arg8[%c0_17, %c0_18] : memref<2x128xf32, #tpu.memory_space<vmem>>, vector<2x128xf32>
    tpu.vector_store %arg8[%c0_17, %c0_18], %19 {strides = array<i32>} : memref<2x128xf32, #tpu.memory_space<vmem>>, vector<2x128xf32>,
    return
  }
  func.func @transform_0(%arg0: i32) -> (i32, i32) {
    %c0_i32 = arith.constant 0 : i32
    %c0_i32_0 = arith.constant 0 : i32
    return %arg0, %c0_i32 : i32, i32
  }
  func.func @transform_1(%arg0: i32) -> (i32, i32) {
    %c0_i32 = arith.constant 0 : i32
    %c0_i32_0 = arith.constant 0 : i32
    %c0_i32_1 = arith.constant 0 : i32
    return %c0_i32, %c0_i32_0 : i32, i32
  }
  func.func @transform_2(%arg0: i32) -> (i32, i32) {
    %c0_i32 = arith.constant 0 : i32
    %c0_i32_0 = arith.constant 0 : i32
    %c0_i32_1 = arith.constant 0 : i32
    return %c0_i32, %c0_i32_0 : i32, i32
  }
  func.func @transform_3(%arg0: i32) -> (i32, i32) {
    %c0_i32 = arith.constant 0 : i32
    %c0_i32_0 = arith.constant 0 : i32
    %c0_i32_1 = arith.constant 0 : i32
    return %c0_i32, %c0_i32_0 : i32, i32
  }
  func.func @transform_4(%arg0: i32) -> (i32, i32) {
    %c0_i32 = arith.constant 0 : i32
    %c0_i32_0 = arith.constant 0 : i32
    %c0_i32_1 = arith.constant 0 : i32
    return %c0_i32, %c0_i32_0 : i32, i32
  }
  func.func @transform_5(%arg0: i32) -> (i32, i32) {
    %c0_i32 = arith.constant 0 : i32
    %c0_i32_0 = arith.constant 0 : i32
    %c0_i32_1 = arith.constant 0 : i32
    return %c0_i32, %c0_i32_0 : i32, i32
  }
  func.func @transform_6(%arg0: i32) -> (i32, i32) {
    %c0_i32 = arith.constant 0 : i32
    %c0_i32_0 = arith.constant 0 : i32
    %c0_i32_1 = arith.constant 0 : i32
    return %c0_i32, %c0_i32_0 : i32, i32
  }
  func.func @transform_7(%arg0: i32) -> (i32, i32) {
    %c0_i32 = arith.constant 0 : i32
    %c0_i32_0 = arith.constant 0 : i32
    return %arg0, %c0_i32 : i32, i32
  }
}

module attributes {stable_mosaic.version = 11 : i64} {
  func.func @_mlp_kernel(%arg0: i32, %arg1: memref<2x128xf32, #tpu.memory_space<vmem>>, %arg2: memref<128x256xf32, #tpu.memory_space<vmem>>, %arg3: memref<1x256xf32, #tpu.memory_space<vmem>>, %arg4: memref<256x256xf32, #tpu.memory_space<vmem>>, %arg5: memref<1x256xf32, #tpu.memory_space<vmem>>, %arg6: memref<256x128xf32, #tpu.memory_space<vmem>>, %arg7: memref<1x128xf32, #tpu.memory_space<vmem>>, %arg8: memref<2x128xf32, #tpu.memory_space<vmem>>) attributes {dimension_semantics = [#tpu.dimension_semantics<parallel>], iteration_bounds = array<i64: 1>, scalar_prefetch = 0 : i64, scratch_operands = 0 : i64, tpu.core_type = #tpu.core_type<tc>, window_params = [{transform_indices = @transform_0, window_bounds = array<i64: 2, 128>}, {pipeline_mode = #tpu.pipeline_mode<synchronous>, transform_indices = @transform_1, window_bounds = array<i64: 128, 256>}, {pipeline_mode = #tpu.pipeline_mode<synchronous>, transform_indices = @transform_2, window_bounds = array<i64: 1, 256>}, {pipeline_mode = #tpu.pipeline_mode<synchronous>, transform_indices = @transform_3, window_bounds = array<i64: 256, 256>}, {pipeline_mode = #tpu.pipeline_mode<synchronous>, transform_indices = @transform_4, window_bounds = array<i64: 1, 256>}, {pipeline_mode = #tpu.pipeline_mode<synchronous>, transform_indices = @transform_5, window_bounds = array<i64: 256, 128>}, {pipeline_mode = #tpu.pipeline_mode<synchronous>, transform_indices = @transform_6, window_bounds = array<i64: 1, 128>}, {transform_indices = @transform_7, window_bounds = array<i64: 2, 128>}]} {
    %c0 = arith.constant 0 : index
    %c0_0 = arith.constant 0 : index
    %0 = vector.load %arg1[%c0, %c0_0] : memref<2x128xf32, #tpu.memory_space<vmem>>, vector<2x128xf32>
    %c0_1 = arith.constant 0 : index
    %c0_2 = arith.constant 0 : index
    %1 = vector.load %arg2[%c0_1, %c0_2] : memref<128x256xf32, #tpu.memory_space<vmem>>, vector<128x256xf32>
    %c0_3 = arith.constant 0 : index
    %c0_4 = arith.constant 0 : index
    %2 = vector.load %arg3[%c0_3, %c0_4] : memref<1x256xf32, #tpu.memory_space<vmem>>, vector<1x256xf32>
    %cst = arith.constant dense<0.000000e+00> : vector<2x256xf32>
    %3 = tpu.matmul %0, %1, %cst {dimension_numbers = #tpu.dot_dimension_numbers<[1], [0], [0], [1], [0, 0, 1, 1], [], []>} : vector<2x128xf32>, vector<128x256xf32>, vector<2x256xf32> -> vector<2x256xf32>
    %4 = vector.broadcast %2 : vector<1x256xf32> to vector<2x256xf32>
    %5 = arith.addf %3, %4 : vector<2x256xf32>
    %cst_5 = arith.constant 0.000000e+00 : f32
    %6 = vector.broadcast %cst_5 : f32 to vector<2x256xf32>
    %7 = arith.maximumf %5, %6 : vector<2x256xf32>
    %c0_6 = arith.constant 0 : index
    %c0_7 = arith.constant 0 : index
    %8 = vector.load %arg4[%c0_6, %c0_7] : memref<256x256xf32, #tpu.memory_space<vmem>>, vector<256x256xf32>
    %c0_8 = arith.constant 0 : index
    %c0_9 = arith.constant 0 : index
    %9 = vector.load %arg5[%c0_8, %c0_9] : memref<1x256xf32, #tpu.memory_space<vmem>>, vector<1x256xf32>
    %cst_10 = arith.constant dense<0.000000e+00> : vector<2x256xf32>
    %10 = tpu.matmul %7, %8, %cst_10 {dimension_numbers = #tpu.dot_dimension_numbers<[1], [0], [0], [1], [0, 0, 1, 1], [], []>} : vector<2x256xf32>, vector<256x256xf32>, vector<2x256xf32> -> vector<2x256xf32>
    %11 = vector.broadcast %9 : vector<1x256xf32> to vector<2x256xf32>
    %12 = arith.addf %10, %11 : vector<2x256xf32>
    %cst_11 = arith.constant 0.000000e+00 : f32
    %13 = vector.broadcast %cst_11 : f32 to vector<2x256xf32>
    %14 = arith.maximumf %12, %13 : vector<2x256xf32>
    %c0_12 = arith.constant 0 : index
    %c0_13 = arith.constant 0 : index
    %15 = vector.load %arg6[%c0_12, %c0_13] : memref<256x128xf32, #tpu.memory_space<vmem>>, vector<256x128xf32>
    %c0_14 = arith.constant 0 : index
    %c0_15 = arith.constant 0 : index
    %16 = vector.load %arg7[%c0_14, %c0_15] : memref<1x128xf32, #tpu.memory_space<vmem>>, vector<1x128xf32>
    %cst_16 = arith.constant dense<0.000000e+00> : vector<2x128xf32>
    %17 = tpu.matmul %14, %15, %cst_16 {dimension_numbers = #tpu.dot_dimension_numbers<[1], [0], [0], [1], [0, 0, 1, 1], [], []>} : vector<2x256xf32>, vector<256x128xf32>, vector<2x128xf32> -> vector<2x128xf32>
    %18 = vector.broadcast %16 : vector<1x128xf32> to vector<2x128xf32>
    %19 = arith.addf %17, %18 : vector<2x128xf32>
    %c0_17 = arith.constant 0 : index
    %c0_18 = arith.constant 0 : index
    %20 = vector.load %arg8[%c0_17, %c0_18] : memref<2x128xf32, #tpu.memory_space<vmem>>, vector<2x128xf32>
    tpu.vector_store %arg8[%c0_17, %c0_18], %19 {strides = array<i32>} : memref<2x128xf32, #tpu.memory_space<vmem>>, vector<2x128xf32>,
    return
  }
  func.func @transform_0(%arg0: i32) -> (i32, i32) {
    %c0_i32 = arith.constant 0 : i32
    %c0_i32_0 = arith.constant 0 : i32
    return %arg0, %c0_i32 : i32, i32
  }
  func.func @transform_1(%arg0: i32) -> (i32, i32) {
    %c0_i32 = arith.constant 0 : i32
    %c0_i32_0 = arith.constant 0 : i32
    %c0_i32_1 = arith.constant 0 : i32
    return %c0_i32, %c0_i32_0 : i32, i32
  }
  func.func @transform_2(%arg0: i32) -> (i32, i32) {
    %c0_i32 = arith.constant 0 : i32
    %c0_i32_0 = arith.constant 0 : i32
    %c0_i32_1 = arith.constant 0 : i32
    return %c0_i32, %c0_i32_0 : i32, i32
  }
  func.func @transform_3(%arg0: i32) -> (i32, i32) {
    %c0_i32 = arith.constant 0 : i32
    %c0_i32_0 = arith.constant 0 : i32
    %c0_i32_1 = arith.constant 0 : i32
    return %c0_i32, %c0_i32_0 : i32, i32
  }
  func.func @transform_4(%arg0: i32) -> (i32, i32) {
    %c0_i32 = arith.constant 0 : i32
    %c0_i32_0 = arith.constant 0 : i32
    %c0_i32_1 = arith.constant 0 : i32
    return %c0_i32, %c0_i32_0 : i32, i32
  }
  func.func @transform_5(%arg0: i32) -> (i32, i32) {
    %c0_i32 = arith.constant 0 : i32
    %c0_i32_0 = arith.constant 0 : i32
    %c0_i32_1 = arith.constant 0 : i32
    return %c0_i32, %c0_i32_0 : i32, i32
  }
  func.func @transform_6(%arg0: i32) -> (i32, i32) {
    %c0_i32 = arith.constant 0 : i32
    %c0_i32_0 = arith.constant 0 : i32
    %c0_i32_1 = arith.constant 0 : i32
    return %c0_i32, %c0_i32_0 : i32, i32
  }
  func.func @transform_7(%arg0: i32) -> (i32, i32) {
    %c0_i32 = arith.constant 0 : i32
    %c0_i32_0 = arith.constant 0 : i32
    return %arg0, %c0_i32 : i32, i32
  }
}

</mosaic_0001>

<bundles_post_ra>
// kernel: tpu_custom_call.1
= control target key start
LH: loop header
LB: loop body
LE: loop exit
PB: predicated region body
PF: predicated region fallthrough
CT: control target
= control target key end

     0   :  { %12 = vsyncpa [#allocation3], 0  ;;  %s667_s0 = inlined_call_operand.hbm [shape: f32[2,128], index: 0, kind: input, shape index: {}]   ;;  %s668_s1 = inlined_call_operand.hbm [shape: f32[128,256], index: 1, kind: input, shape index: {}]   ;;  %s669_s2 = inlined_call_operand.hbm [shape: f32[1,256], index: 2, kind: input, shape index: {}]   ;;  %s670_s3 = inlined_call_operand.hbm [shape: f32[256,256], index: 3, kind: input, shape index: {}]   ;;  %s671_s4 = inlined_call_operand.vmem [shape: f32[1,256], index: 4, kind: input, shape index: {}]   ;;  %s672_s5 = inlined_call_operand.hbm [shape: f32[256,128], index: 5, kind: input, shape index: {}]   ;;  %s673_s6 = inlined_call_operand.vmem [shape: f32[1,128], index: 6, kind: input, shape index: {}]   ;;  %s674_s7 = inlined_call_operand.hbm [shape: f32[2,128], index: 7, kind: output, shape index: {}]  }
   0x1   :  { %13 = vsyncpa [#allocation6], 0 }
   0x2   :  { %14 = vsyncpa [#allocation9], 0  ;;  %s31_s26 = sshll.u32 %s668_s1, 4  ;;  %s32_s26 = int_to_ptr.hbm [resolvable:$true] %s31_s26 }
   0x3   :  { %15 = vsyncpa [#allocation4], 0  ;;  %s593_s27 = smov [#allocation5]   ;;  %s55_s8 = sshll.u32 %s670_s3, 4  ;;  %s56_s8 = int_to_ptr.hbm [resolvable:$true] %s55_s8 }
   0x4   :  { %s33_s28 = sshll.u32 %s593_s27, 4  ;;  %s594_s9 = smov 256   ;;  %s34_s28 = int_to_ptr.vmem [resolvable:$true] %s33_s28 }
   0x5   :  { %s595_s10 = smov 16   ;;  %s596_s11 = smov [#allocation8]  }
   0x6   :  { %39 = dma.hbm_to_vmem [thread:$0]  %s32_s26, 4096, %s34_s28, [#allocation6], %s594_s9, %s594_s9, %s595_s10  }
   0x7   :  { %s57_s12 = sshll.u32 %s596_s11, 4  ;;  %s21_s15 = sshll.u32 %s667_s0, 4  ;;  %s58_s12 = int_to_ptr.vmem [resolvable:$true] %s57_s12  ;;  %s22_s15 = int_to_ptr.hbm [resolvable:$true] %s21_s15 }
   0x8   :  { %63 = dma.hbm_to_vmem [thread:$0]  %s56_s8, 8192, %s58_s12, [#allocation9], %s594_s9, %s594_s9, %s595_s10  }
   0x9   :  { %s45_s17 = sshll.u32 %s669_s2, 4  ;;  %s597_s18 = smov [#allocation2]   ;;  %s46_s17 = int_to_ptr.hbm [resolvable:$true] %s45_s17 }
   0xa   :  { %s23_s19 = sshll.u32 %s597_s18, 4  ;;  %s598_s3 = smov [#allocation7]   ;;  %s24_s19 = int_to_ptr.vmem [resolvable:$true] %s23_s19 }
   0xb   :  { %26 = dma.hbm_to_vmem [thread:$0]  %s22_s15, 32, %s24_s19, [#allocation3]  }
   0xc   :  { %s47_s20 = sshll.u32 %s598_s3, 4  ;;  %s70_s23 = sshll.u32 %s672_s5, 4  ;;  %s48_s20 = int_to_ptr.vmem [resolvable:$true] %s47_s20  ;;  %s71_s23 = int_to_ptr.hbm [resolvable:$true] %s70_s23 }
   0xd   :  { %50 = dma.hbm_to_vmem [thread:$0]  %s46_s17, 32, %s48_s20, [#allocation6]  }
   0xe   :  { %s599_s0 = smov [#allocation10]   ;;  %s600_s25 = smov 128  }
   0xf   :  { %s72_s24 = sshll.u32 %s599_s0, 4  ;;  %s601_s26 = smov 8   ;;  %s73_s24 = int_to_ptr.vmem [resolvable:$true] %s72_s24 }
  0x10   :  { %78 = dma.hbm_to_vmem [thread:$0]  %s71_s23, 4096, %s73_s24, [#allocation9], %s600_s25, %s600_s25, %s601_s26  }
  0x11   :  { %585 = dma.done.wait [#allocation3], 32  }
  0x12   :  { %586 = vsyncadd [#allocation3], 4294967264 }
  0x13   :  { %587 = dma.done.wait [#allocation6], 4128  }
  0x14   :  { %588 = vsyncadd [#allocation6], 4294963168 }
  0x15   :  { %589 = dma.done.wait [#allocation9], 12288  }
  0x16   :  { %590 = vsyncadd [#allocation9], 4294955008  ;;  %v132_v0 = vld [vmem:[#allocation5 + $0xf0] sm:$0xff]  ;;  %v130_v1 = vld [vmem:[#allocation5 + $0xe0] sm:$0xff]  ;;  %s418_s9 = sshll.u32 %s674_s7, 4  ;;  %s419_s9 = int_to_ptr.hbm [resolvable:$true] %s418_s9 }
  0x17   :  { %v133_v2 = vld [vmem:[#allocation5 + $0xf8] sm:$0xff]  ;;  %140 = vmatpush.msra.mxu0 %v132_v0  ;;  %v131_v3 = vld [vmem:[#allocation5 + $0xe8] sm:$0xff]  ;;  %v128_v4 = vld [vmem:[#allocation5 + $0xd0] sm:$0xff] }
  0x18   :  { %160 = vmatpush.msra.mxu1 %v133_v2  ;;  %v129_v5 = vld [vmem:[#allocation5 + $0xd8] sm:$0xff]  ;;  %v126_v6 = vld [vmem:[#allocation5 + $0xc0] sm:$0xff]  ;;  %v127_v7 = vld [vmem:[#allocation5 + $0xc8] sm:$0xff] }
  0x19   :  { %141 = vmatpush.msra.mxu0 %v130_v1  ;;  %v124_v8 = vld [vmem:[#allocation5 + $0xb0] sm:$0xff]  ;;  %v125_v9 = vld [vmem:[#allocation5 + $0xb8] sm:$0xff]  ;;  %v122_v10 = vld [vmem:[#allocation5 + $0xa0] sm:$0xff] }
  0x1a   :  { %161 = vmatpush.msra.mxu1 %v131_v3  ;;  %v123_v11 = vld [vmem:[#allocation5 + $0xa8] sm:$0xff]  ;;  %v120_v12 = vld [vmem:[#allocation5 + $0x90] sm:$0xff]  ;;  %v121_v13 = vld [vmem:[#allocation5 + $0x98] sm:$0xff] }
  0x1b   :  { %142 = vmatpush.msra.mxu0 %v128_v4  ;;  %v212_v14 = vld [vmem:[#allocation8 + $0xf0] sm:$0xff]  ;;  %v210_v15 = vld [vmem:[#allocation8 + $0xe0] sm:$0xff]  ;;  %v101_v51 = vld [vmem:[#allocation2] sm:$0x3] }
  0x1c   :  { %162 = vmatpush.msra.mxu1 %v129_v5  ;;  %v118_v16 = vld [vmem:[#allocation5 + $0x80] sm:$0xff]  ;;  %v119_v17 = vld [vmem:[#allocation5 + $0x88] sm:$0xff]  ;;  %252 = vmatpush.msra.mxu2 %v212_v14  ;;  %v244_v18 = vld [vmem:[#allocation8 + $0x1f0] sm:$0xff] }
  0x1d   :  { %143 = vmatpush.msra.mxu0 %v126_v6  ;;  %v208_v19 = vld [vmem:[#allocation8 + $0xd0] sm:$0xff]  ;;  %v242_v20 = vld [vmem:[#allocation8 + $0x1e0] sm:$0xff]  ;;  %272 = vmatpush.msra.mxu3 %v244_v18  ;;  %v213_v52 = vld [vmem:[#allocation8 + $0xf8] sm:$0xff] }
  0x1e   :  { %163 = vmatpush.msra.mxu1 %v127_v7  ;;  %v116_v21 = vld [vmem:[#allocation5 + $0x70] sm:$0xff]  ;;  %v117_v22 = vld [vmem:[#allocation5 + $0x78] sm:$0xff]  ;;  %253 = vmatpush.msra.mxu2 %v210_v15  ;;  %v206_v23 = vld [vmem:[#allocation8 + $0xc0] sm:$0xff] }
  0x1f   :  { %144 = vmatpush.msra.mxu0 %v124_v8  ;;  %v240_v24 = vld [vmem:[#allocation8 + $0x1d0] sm:$0xff]  ;;  %v114_v25 = vld [vmem:[#allocation5 + $0x60] sm:$0xff]  ;;  %v115_v26 = vld [vmem:[#allocation5 + $0x68] sm:$0xff]  ;;  %273 = vmatpush.msra.mxu3 %v242_v20 }
  0x20   :  { %164 = vmatpush.msra.mxu1 %v125_v9  ;;  %254 = vmatpush.msra.mxu2 %v208_v19  ;;  %v204_v27 = vld [vmem:[#allocation8 + $0xb0] sm:$0xff]  ;;  %v238_v28 = vld [vmem:[#allocation8 + $0x1c0] sm:$0xff]  ;;  %v245_v53 = vld [vmem:[#allocation8 + $0x1f8] sm:$0xff] }
  0x21   :  { %145 = vmatpush.msra.mxu0 %v122_v10  ;;  %v112_v29 = vld [vmem:[#allocation5 + $0x50] sm:$0xff]  ;;  %v113_v30 = vld [vmem:[#allocation5 + $0x58] sm:$0xff]  ;;  %274 = vmatpush.msra.mxu3 %v240_v24  ;;  %v202_v31 = vld [vmem:[#allocation8 + $0xa0] sm:$0xff] }
  0x22   :  { %165 = vmatpush.msra.mxu1 %v123_v11  ;;  %255 = vmatpush.msra.mxu2 %v206_v23  ;;  %v236_v32 = vld [vmem:[#allocation8 + $0x1b0] sm:$0xff]  ;;  %v110_v33 = vld [vmem:[#allocation5 + $0x40] sm:$0xff]  ;;  %v111_v34 = vld [vmem:[#allocation5 + $0x48] sm:$0xff] }
  0x23   :  { %146 = vmatpush.msra.mxu0 %v120_v12  ;;  %275 = vmatpush.msra.mxu3 %v238_v28  ;;  %v200_v35 = vld [vmem:[#allocation8 + $0x90] sm:$0xff]  ;;  %v234_v36 = vld [vmem:[#allocation8 + $0x1a0] sm:$0xff]  ;;  %v211_v56 = vld [vmem:[#allocation8 + $0xe8] sm:$0xff] }
  0x24   :  { %166 = vmatpush.msra.mxu1 %v121_v13  ;;  %256 = vmatpush.msra.mxu2 %v204_v27  ;;  %v108_v37 = vld [vmem:[#allocation5 + $0x30] sm:$0xff]  ;;  %v109_v38 = vld [vmem:[#allocation5 + $0x38] sm:$0xff]  ;;  %v198_v39 = vld [vmem:[#allocation8 + $0x80] sm:$0xff] }
  0x25   :  { %147 = vmatpush.msra.mxu0 %v118_v16  ;;  %276 = vmatpush.msra.mxu3 %v236_v32  ;;  %v232_v40 = vld [vmem:[#allocation8 + $0x190] sm:$0xff]  ;;  %v106_v41 = vld [vmem:[#allocation5 + $0x20] sm:$0xff]  ;;  %v107_v42 = vld [vmem:[#allocation5 + $0x28] sm:$0xff] }
  0x26   :  { %167 = vmatpush.msra.mxu1 %v119_v17  ;;  %257 = vmatpush.msra.mxu2 %v202_v31  ;;  %v196_v43 = vld [vmem:[#allocation8 + $0x70] sm:$0xff]  ;;  %v230_v44 = vld [vmem:[#allocation8 + $0x180] sm:$0xff]  ;;  %v243_v57 = vld [vmem:[#allocation8 + $0x1e8] sm:$0xff] }
  0x27   :  { %148 = vmatpush.msra.mxu0 %v116_v21  ;;  %277 = vmatpush.msra.mxu3 %v234_v36  ;;  %v104_v45 = vld [vmem:[#allocation5 + $0x10] sm:$0xff]  ;;  %v105_v46 = vld [vmem:[#allocation5 + $0x18] sm:$0xff]  ;;  %v194_v47 = vld [vmem:[#allocation8 + $0x60] sm:$0xff] }
  0x28   :  { %168 = vmatpush.msra.mxu1 %v117_v22  ;;  %258 = vmatpush.msra.mxu2 %v200_v35  ;;  %v228_v48 = vld [vmem:[#allocation8 + $0x170] sm:$0xff]  ;;  %v102_v49 = vld [vmem:[#allocation5] sm:$0xff]  ;;  %v103_v50 = vld [vmem:[#allocation5 + $0x8] sm:$0xff] }
  0x29   :  { %149 = vmatpush.msra.mxu0 %v114_v25  ;;  %278 = vmatpush.msra.mxu3 %v232_v40  ;;  %v192_v54 = vld [vmem:[#allocation8 + $0x50] sm:$0xff]  ;;  %v226_v55 = vld [vmem:[#allocation8 + $0x160] sm:$0xff]  ;;  %v209_v60 = vld [vmem:[#allocation8 + $0xd8] sm:$0xff] }
  0x2a   :  { %169 = vmatpush.msra.mxu1 %v115_v26  ;;  %259 = vmatpush.msra.mxu2 %v198_v39  ;;  %v190_v58 = vld [vmem:[#allocation8 + $0x40] sm:$0xff]  ;;  %v224_v59 = vld [vmem:[#allocation8 + $0x150] sm:$0xff]  ;;  %v241_v61 = vld [vmem:[#allocation8 + $0x1d8] sm:$0xff] }
  0x2b   :  { %150 = vmatpush.msra.mxu0 %v112_v29  ;;  %279 = vmatpush.msra.mxu3 %v230_v44  ;;  %v188_v62 = vld [vmem:[#allocation8 + $0x30] sm:$0xff]  ;;  %v222_v63 = vld [vmem:[#allocation8 + $0x140] sm:$0xff]  ;;  %v207_v0 = vld [vmem:[#allocation8 + $0xc8] sm:$0xff] }
  0x2c   :  { %170 = vmatpush.msra.mxu1 %v113_v30  ;;  %260 = vmatpush.msra.mxu2 %v196_v43  ;;  %v239_v1 = vld [vmem:[#allocation8 + $0x1c8] sm:$0xff]  ;;  %v205_v2 = vld [vmem:[#allocation8 + $0xb8] sm:$0xff]  ;;  %v186_v19 = vld [vmem:[#allocation8 + $0x20] sm:$0xff] }
  0x2d   :  { %151 = vmatpush.msra.mxu0 %v110_v33  ;;  %280 = vmatpush.msra.mxu3 %v228_v48  ;;  %v237_v3 = vld [vmem:[#allocation8 + $0x1b8] sm:$0xff]  ;;  %v203_v4 = vld [vmem:[#allocation8 + $0xa8] sm:$0xff]  ;;  %v220_v20 = vld [vmem:[#allocation8 + $0x130] sm:$0xff] }
  0x2e   :  { %171 = vmatpush.msra.mxu1 %v111_v34  ;;  %261 = vmatpush.msra.mxu2 %v194_v47  ;;  %v235_v5 = vld [vmem:[#allocation8 + $0x1a8] sm:$0xff]  ;;  %v201_v6 = vld [vmem:[#allocation8 + $0x98] sm:$0xff]  ;;  %v184_v23 = vld [vmem:[#allocation8 + $0x10] sm:$0xff] }
  0x2f   :  { %152 = vmatpush.msra.mxu0 %v108_v37  ;;  %281 = vmatpush.msra.mxu3 %v226_v55  ;;  %v233_v7 = vld [vmem:[#allocation8 + $0x198] sm:$0xff]  ;;  %v199_v8 = vld [vmem:[#allocation8 + $0x88] sm:$0xff]  ;;  %v218_v24 = vld [vmem:[#allocation8 + $0x120] sm:$0xff] }
  0x30   :  { %172 = vmatpush.msra.mxu1 %v109_v38  ;;  %262 = vmatpush.msra.mxu2 %v192_v54  ;;  %v231_v9 = vld [vmem:[#allocation8 + $0x188] sm:$0xff]  ;;  %v197_v10 = vld [vmem:[#allocation8 + $0x78] sm:$0xff]  ;;  %v182_v27 = vld [vmem:[#allocation8] sm:$0xff] }
  0x31   :  { %153 = vmatpush.msra.mxu0 %v106_v41  ;;  %282 = vmatpush.msra.mxu3 %v224_v59  ;;  %v229_v11 = vld [vmem:[#allocation8 + $0x178] sm:$0xff]  ;;  %v195_v12 = vld [vmem:[#allocation8 + $0x68] sm:$0xff]  ;;  %v216_v28 = vld [vmem:[#allocation8 + $0x110] sm:$0xff] }
  0x32   :  { %173 = vmatpush.msra.mxu1 %v107_v42  ;;  %263 = vmatpush.msra.mxu2 %v190_v58  ;;  %v227_v13 = vld [vmem:[#allocation8 + $0x168] sm:$0xff]  ;;  %v193_v14 = vld [vmem:[#allocation8 + $0x58] sm:$0xff]  ;;  %v214_v31 = vld [vmem:[#allocation8 + $0x100] sm:$0xff] }
  0x33   :  { %154 = vmatpush.msra.mxu0 %v104_v45  ;;  %283 = vmatpush.msra.mxu3 %v222_v63  ;;  %v225_v15 = vld [vmem:[#allocation8 + $0x158] sm:$0xff]  ;;  %v191_v16 = vld [vmem:[#allocation8 + $0x48] sm:$0xff]  ;;  %v364_v34 = vld [vmem:[#allocation10 + $0xf0] sm:$0xff] }
  0x34   :  { %174 = vmatpush.msra.mxu1 %v105_v46  ;;  %264 = vmatpush.msra.mxu2 %v188_v62  ;;  %v223_v17 = vld [vmem:[#allocation8 + $0x148] sm:$0xff]  ;;  %v189_v18 = vld [vmem:[#allocation8 + $0x38] sm:$0xff]  ;;  %v348_v36 = vld [vmem:[#allocation10 + $0x70] sm:$0xff] }
  0x35   :  { %155 = vmatpush.msra.mxu0 %v102_v49  ;;  %v187_v21 = vld [vmem:[#allocation8 + $0x28] sm:$0xff]  ;;  %284 = vmatpush.msra.mxu3 %v220_v20  ;;  %v221_v22 = vld [vmem:[#allocation8 + $0x138] sm:$0xff]  ;;  %v362_v39 = vld [vmem:[#allocation10 + $0xe0] sm:$0xff] }
  0x36   :  { %175 = vmatpush.msra.mxu1 %v103_v50  ;;  %156 = vmatmul.f32.vlgmr.msra.gmra.mxu0 %v101_v51  ;;  %v185_v25 = vld [vmem:[#allocation8 + $0x18] sm:$0xff]  ;;  %v219_v26 = vld [vmem:[#allocation8 + $0x128] sm:$0xff]  ;;  %v346_v40 = vld [vmem:[#allocation10 + $0x60] sm:$0xff] }
  0x37   :  { %176 = vmatmul.f32.vlgmr.msra.gmra.mxu1 %v101_v51  ;;  %292 = vmatpush.msrb.mxu0 %v213_v52  ;;  %v183_v29 = vld [vmem:[#allocation8 + $0x8] sm:$0xff]  ;;  %v217_v30 = vld [vmem:[#allocation8 + $0x118] sm:$0xff]  ;;  %v360_v43 = vld [vmem:[#allocation10 + $0xd0] sm:$0xff] }
  0x38   :  { %312 = vmatpush.msrb.mxu1 %v245_v53  ;;  %265 = vmatpush.msra.mxu2 %v186_v19  ;;  %v215_v32 = vld [vmem:[#allocation8 + $0x108] sm:$0xff]  ;;  %v365_v33 = vld [vmem:[#allocation10 + $0xf8] sm:$0xff]  ;;  %v344_v44 = vld [vmem:[#allocation10 + $0x50] sm:$0xff] }
  0x39   :  { %293 = vmatpush.msrb.mxu0 %v211_v56  ;;  %285 = vmatpush.msra.mxu3 %v218_v24  ;;  %v349_v35 = vld [vmem:[#allocation10 + $0x78] sm:$0xff]  ;;  %v363_v37 = vld [vmem:[#allocation10 + $0xe8] sm:$0xff]  ;;  %v358_v47 = vld [vmem:[#allocation10 + $0xc0] sm:$0xff] }
  0x3a   :  { %313 = vmatpush.msrb.mxu1 %v243_v57  ;;  %266 = vmatpush.msra.mxu2 %v184_v23  ;;  %v347_v38 = vld [vmem:[#allocation10 + $0x68] sm:$0xff]  ;;  %v361_v41 = vld [vmem:[#allocation10 + $0xd8] sm:$0xff]  ;;  %v342_v48 = vld [vmem:[#allocation10 + $0x40] sm:$0xff] }
  0x3b   :  { %294 = vmatpush.msrb.mxu0 %v209_v60  ;;  %286 = vmatpush.msra.mxu3 %v216_v28  ;;  %v345_v42 = vld [vmem:[#allocation10 + $0x58] sm:$0xff]  ;;  %v359_v45 = vld [vmem:[#allocation10 + $0xc8] sm:$0xff]  ;;  %v356_v51 = vld [vmem:[#allocation10 + $0xb0] sm:$0xff] }
  0x3c   :  { %314 = vmatpush.msrb.mxu1 %v241_v61  ;;  %267 = vmatpush.msra.mxu2 %v182_v27  ;;  %v343_v46 = vld [vmem:[#allocation10 + $0x48] sm:$0xff]  ;;  %v357_v49 = vld [vmem:[#allocation10 + $0xb8] sm:$0xff]  ;;  %v354_v54 = vld [vmem:[#allocation10 + $0xa0] sm:$0xff] }
  0x3d   :  { %295 = vmatpush.msrb.mxu0 %v207_v0  ;;  %287 = vmatpush.msra.mxu3 %v214_v31  ;;  %v341_v50 = vld [vmem:[#allocation10 + $0x38] sm:$0xff]  ;;  %v355_v52 = vld [vmem:[#allocation10 + $0xa8] sm:$0xff]  ;;  %v340_v63 = vld [vmem:[#allocation10 + $0x30] sm:$0xff] }
  0x3e   :  { %315 = vmatpush.msrb.mxu1 %v239_v1  ;;  %370 = vmatpush.msrb.mxu2 %v349_v35  ;;  %v134_v53 = vld [vmem:[#allocation7] sm:$0x3]  ;;  %v339_v1 = vld [vmem:[#allocation10 + $0x28] sm:$0xff]  ;;  %v440_v23 = vld [vmem:[%s673_s6] ss:$0 sm:$0xff] }
  0x3f   :  { %296 = vmatpush.msrb.mxu0 %v205_v2  ;;  %390 = vmatpush.msrb.mxu3 %v365_v33  ;;  %v136_v55 = vperm.slane %v134_v53, 0  ;;  %v137_v56 = vperm.slane %v134_v53, 1  ;;  %v353_v0 = vld [vmem:[#allocation10 + $0x98] sm:$0xff]  ;;  %v352_v2 = vld [vmem:[#allocation10 + $0x90] sm:$0xff] }
  0x40   :  { %316 = vmatpush.msrb.mxu1 %v237_v3  ;;  %371 = vmatpush.msrb.mxu2 %v348_v36  ;;  %v338_v3 = vld [vmem:[#allocation10 + $0x20] sm:$0xff] }
  0x41   :  { %297 = vmatpush.msrb.mxu0 %v203_v4  ;;  %391 = vmatpush.msrb.mxu3 %v364_v34  ;;  %v351_v4 = vld [vmem:[#allocation10 + $0x88] sm:$0xff] }
  0x42   :  { %317 = vmatpush.msrb.mxu1 %v235_v5  ;;  %372 = vmatpush.msrb.mxu2 %v347_v38  ;;  %v337_v5 = vld [vmem:[#allocation10 + $0x18] sm:$0xff] }
  0x43   :  { %298 = vmatpush.msrb.mxu0 %v201_v6  ;;  %392 = vmatpush.msrb.mxu3 %v363_v37  ;;  %v350_v6 = vld [vmem:[#allocation10 + $0x80] sm:$0xff] }
  0x44   :  { %318 = vmatpush.msrb.mxu1 %v233_v7  ;;  %373 = vmatpush.msrb.mxu2 %v346_v40  ;;  %v336_v7 = vld [vmem:[#allocation10 + $0x10] sm:$0xff] }
  0x45   :  { %299 = vmatpush.msrb.mxu0 %v199_v8  ;;  %393 = vmatpush.msrb.mxu3 %v362_v39  ;;  %v335_v8 = vld [vmem:[#allocation10 + $0x8] sm:$0xff] }
  0x46   :  { %319 = vmatpush.msrb.mxu1 %v231_v9  ;;  %374 = vmatpush.msrb.mxu2 %v345_v42  ;;  %v334_v9 = vld [vmem:[#allocation10] sm:$0xff] }
  0x47   :  { %300 = vmatpush.msrb.mxu0 %v197_v10  ;;  %394 = vmatpush.msrb.mxu3 %v361_v41  ;;  %v246_v10 = vld [vmem:[%s671_s4] sm:$0x3]  ;;  %s602_s4 = smov [#allocation11]  }
  0x48   :  { %320 = vmatpush.msrb.mxu1 %v229_v11  ;;  %375 = vmatpush.msrb.mxu2 %v344_v44  ;;  %v249_v11 = vperm.slane %v246_v10, 1  ;;  %s416_s29 = sshll.u32 %s602_s4, 4  ;;  %s417_s29 = int_to_ptr.vmem [resolvable:$true] %s416_s29 }
  0x49   :  { %301 = vmatpush.msrb.mxu0 %v195_v12  ;;  %395 = vmatpush.msrb.mxu3 %v360_v43 }
  0x4a   :  { %321 = vmatpush.msrb.mxu1 %v227_v13  ;;  %376 = vmatpush.msrb.mxu2 %v343_v46 }
  0x4b   :  { %302 = vmatpush.msrb.mxu0 %v193_v14  ;;  %396 = vmatpush.msrb.mxu3 %v359_v45 }
  0x4c   :  { %322 = vmatpush.msrb.mxu1 %v225_v15  ;;  %377 = vmatpush.msrb.mxu2 %v342_v48 }
  0x4d   :  { %303 = vmatpush.msrb.mxu0 %v191_v16  ;;  %397 = vmatpush.msrb.mxu3 %v358_v47  ;;  %v248_v16 = vperm.slane %v246_v10, 0 }
  0x4e   :  { %323 = vmatpush.msrb.mxu1 %v223_v17  ;;  %378 = vmatpush.msrb.mxu2 %v341_v50 }
  0x4f   :  { %304 = vmatpush.msrb.mxu0 %v189_v18  ;;  %398 = vmatpush.msrb.mxu3 %v357_v49 }
  0x50   :  { %324 = vmatpush.msrb.mxu1 %v221_v22  ;;  %379 = vmatpush.msrb.mxu2 %v340_v63 }
  0x51   :  { %305 = vmatpush.msrb.mxu0 %v187_v21  ;;  %399 = vmatpush.msrb.mxu3 %v356_v51 }
  0x52   :  { %325 = vmatpush.msrb.mxu1 %v219_v26  ;;  %380 = vmatpush.msrb.mxu2 %v339_v1 }
  0x53   :  { %306 = vmatpush.msrb.mxu0 %v185_v25  ;;  %400 = vmatpush.msrb.mxu3 %v355_v52 }
  0x54   :  { %326 = vmatpush.msrb.mxu1 %v217_v30  ;;  %381 = vmatpush.msrb.mxu2 %v338_v3 }
  0x55   :  { %307 = vmatpush.msrb.mxu0 %v183_v29  ;;  %401 = vmatpush.msrb.mxu3 %v354_v54 }
  0x56   :  { %327 = vmatpush.msrb.mxu1 %v215_v32  ;;  %382 = vmatpush.msrb.mxu2 %v337_v5 }
  0x57   :  { %402 = vmatpush.msrb.mxu3 %v353_v0 }
  0x58   :  { %383 = vmatpush.msrb.mxu2 %v336_v7 }
  0x59   :  { %403 = vmatpush.msrb.mxu3 %v352_v2 }
  0x5a   :  { %384 = vmatpush.msrb.mxu2 %v335_v8 }
  0x5b   :  { %404 = vmatpush.msrb.mxu3 %v351_v4 }
  0x5c   :  { %385 = vmatpush.msrb.mxu2 %v334_v9 }
  0x5d   :  { %405 = vmatpush.msrb.mxu3 %v350_v6 }
  0xb3   :  { %v157_v57 = vpop.f32.mrf.mxu0 }
  0xb4   :  { %v177_v58 = vpop.f32.mrf.mxu1  ;;  %v158_v59 = vadd.f32 %v157_v57, %v136_v55 }
  0xb5   :  { %v178_v60 = vadd.f32 %v177_v58, %v137_v56 }
  0xb6   :  { %v180_v61 = vmax.f32 %v158_v59, 0.0 }
  0xb7   :  { %v181_v62 = vmax.f32 %v178_v60, 0.0 }
  0xb8   :  { %268 = vmatmul.f32.vlgmr.msra.gmra.mxu2 %v180_v61  ;;  %308 = vmatmul.f32.vlgmr.msrb.gmra.mxu0 %v180_v61 }
  0xb9   :  { %288 = vmatmul.f32.vlgmr.msra.gmra.mxu3 %v181_v62  ;;  %328 = vmatmul.f32.vlgmr.msrb.gmra.mxu1 %v181_v62 }
 0x135   :  { %v309_v12 = vpop.f32.mrf.mxu0 }
 0x136   :  { %v310_v13 = vadd.f32 %v309_v12, %v249_v11  ;;  %v329_v14 = vpop.f32.mrf.mxu1 }
 0x138   :  { %v330_v15 = vadd.f32 %v329_v14, %v310_v13 }
 0x13a   :  { %v333_v17 = vmax.f32 %v330_v15, 0.0 }
 0x13b   :  { %v269_v18 = vpop.f32.mrf.mxu2 }
 0x13c   :  { %v270_v19 = vadd.f32 %v269_v18, %v248_v16  ;;  %406 = vmatmul.f32.vlgmr.msrb.gmra.mxu3 %v333_v17  ;;  %v289_v20 = vpop.f32.mrf.mxu3 }
 0x13e   :  { %v290_v21 = vadd.f32 %v289_v20, %v270_v19 }
 0x140   :  { %v332_v22 = vmax.f32 %v290_v21, 0.0 }
 0x142   :  { %386 = vmatmul.f32.vlgmr.msrb.gmra.mxu2 %v332_v22 }
 0x1bf   :  { %v407_v26 = vpop.f32.mrf.mxu3 }
 0x1c5   :  { %v387_v24 = vpop.f32.mrf.mxu2 }
 0x1c6   :  { %v388_v25 = vadd.f32 %v440_v23, %v387_v24 }
 0x1c8   :  { %v408_v27 = vadd.f32 %v407_v26, %v388_v25 }
 0x1ca   :  { %410 = vst [vmem:[#allocation11] sm:$0x3] %v408_v27 }
 0x1cb   :  { %421 = dma.vmem_to_hbm [thread:$0]  %s417_s29, 32, %s419_s9, [#allocation4]  }
 0x1cc   :  { %591 = dma.done.wait [#allocation4], 32  }
 0x1cd   :  { %592 = vsyncadd [#allocation4], 4294967264 }
 0x1ce   :  { %426 = vsyncpa [#allocation3], 1 }
 0x1cf   :  { %427 = vsyncpa [#allocation6], 1 }
 0x1d0   :  { %428 = vsyncpa [#allocation9], 1 }
 0x1d1   :  { %429 = vsyncpa [#allocation4], 1 }

// kernel: tpu_custom_call.1
= control target key start
LH: loop header
LB: loop body
LE: loop exit
PB: predicated region body
PF: predicated region fallthrough
CT: control target
= control target key end

     0   :  { %12 = vsyncpa [#allocation3], 0  ;;  %s667_s0 = inlined_call_operand.hbm [shape: f32[2,128], index: 0, kind: input, shape index: {}]   ;;  %s668_s1 = inlined_call_operand.hbm [shape: f32[128,256], index: 1, kind: input, shape index: {}]   ;;  %s669_s2 = inlined_call_operand.hbm [shape: f32[1,256], index: 2, kind: input, shape index: {}]   ;;  %s670_s3 = inlined_call_operand.hbm [shape: f32[256,256], index: 3, kind: input, shape index: {}]   ;;  %s671_s4 = inlined_call_operand.vmem [shape: f32[1,256], index: 4, kind: input, shape index: {}]   ;;  %s672_s5 = inlined_call_operand.hbm [shape: f32[256,128], index: 5, kind: input, shape index: {}]   ;;  %s673_s6 = inlined_call_operand.vmem [shape: f32[1,128], index: 6, kind: input, shape index: {}]   ;;  %s674_s7 = inlined_call_operand.hbm [shape: f32[2,128], index: 7, kind: output, shape index: {}]  }
   0x1   :  { %13 = vsyncpa [#allocation6], 0 }
   0x2   :  { %14 = vsyncpa [#allocation9], 0  ;;  %s31_s26 = sshll.u32 %s668_s1, 4  ;;  %s32_s26 = int_to_ptr.hbm [resolvable:$true] %s31_s26 }
   0x3   :  { %15 = vsyncpa [#allocation4], 0  ;;  %s593_s27 = smov [#allocation5]   ;;  %s55_s8 = sshll.u32 %s670_s3, 4  ;;  %s56_s8 = int_to_ptr.hbm [resolvable:$true] %s55_s8 }
   0x4   :  { %s33_s28 = sshll.u32 %s593_s27, 4  ;;  %s594_s9 = smov 256   ;;  %s34_s28 = int_to_ptr.vmem [resolvable:$true] %s33_s28 }
   0x5   :  { %s595_s10 = smov 16   ;;  %s596_s11 = smov [#allocation8]  }
   0x6   :  { %39 = dma.hbm_to_vmem [thread:$0]  %s32_s26, 4096, %s34_s28, [#allocation6], %s594_s9, %s594_s9, %s595_s10  }
   0x7   :  { %s57_s12 = sshll.u32 %s596_s11, 4  ;;  %s21_s15 = sshll.u32 %s667_s0, 4  ;;  %s58_s12 = int_to_ptr.vmem [resolvable:$true] %s57_s12  ;;  %s22_s15 = int_to_ptr.hbm [resolvable:$true] %s21_s15 }
   0x8   :  { %63 = dma.hbm_to_vmem [thread:$0]  %s56_s8, 8192, %s58_s12, [#allocation9], %s594_s9, %s594_s9, %s595_s10  }
   0x9   :  { %s45_s17 = sshll.u32 %s669_s2, 4  ;;  %s597_s18 = smov [#allocation2]   ;;  %s46_s17 = int_to_ptr.hbm [resolvable:$true] %s45_s17 }
   0xa   :  { %s23_s19 = sshll.u32 %s597_s18, 4  ;;  %s598_s3 = smov [#allocation7]   ;;  %s24_s19 = int_to_ptr.vmem [resolvable:$true] %s23_s19 }
   0xb   :  { %26 = dma.hbm_to_vmem [thread:$0]  %s22_s15, 32, %s24_s19, [#allocation3]  }
   0xc   :  { %s47_s20 = sshll.u32 %s598_s3, 4  ;;  %s70_s23 = sshll.u32 %s672_s5, 4  ;;  %s48_s20 = int_to_ptr.vmem [resolvable:$true] %s47_s20  ;;  %s71_s23 = int_to_ptr.hbm [resolvable:$true] %s70_s23 }
   0xd   :  { %50 = dma.hbm_to_vmem [thread:$0]  %s46_s17, 32, %s48_s20, [#allocation6]  }
   0xe   :  { %s599_s0 = smov [#allocation10]   ;;  %s600_s25 = smov 128  }
   0xf   :  { %s72_s24 = sshll.u32 %s599_s0, 4  ;;  %s601_s26 = smov 8   ;;  %s73_s24 = int_to_ptr.vmem [resolvable:$true] %s72_s24 }
  0x10   :  { %78 = dma.hbm_to_vmem [thread:$0]  %s71_s23, 4096, %s73_s24, [#allocation9], %s600_s25, %s600_s25, %s601_s26  }
  0x11   :  { %585 = dma.done.wait [#allocation3], 32  }
  0x12   :  { %586 = vsyncadd [#allocation3], 4294967264 }
  0x13   :  { %587 = dma.done.wait [#allocation6], 4128  }
  0x14   :  { %588 = vsyncadd [#allocation6], 4294963168 }
  0x15   :  { %589 = dma.done.wait [#allocation9], 12288  }
  0x16   :  { %590 = vsyncadd [#allocation9], 4294955008  ;;  %v132_v0 = vld [vmem:[#allocation5 + $0xf0] sm:$0xff]  ;;  %v130_v1 = vld [vmem:[#allocation5 + $0xe0] sm:$0xff]  ;;  %s418_s9 = sshll.u32 %s674_s7, 4  ;;  %s419_s9 = int_to_ptr.hbm [resolvable:$true] %s418_s9 }
  0x17   :  { %v133_v2 = vld [vmem:[#allocation5 + $0xf8] sm:$0xff]  ;;  %140 = vmatpush.msra.mxu0 %v132_v0  ;;  %v131_v3 = vld [vmem:[#allocation5 + $0xe8] sm:$0xff]  ;;  %v128_v4 = vld [vmem:[#allocation5 + $0xd0] sm:$0xff] }
  0x18   :  { %160 = vmatpush.msra.mxu1 %v133_v2  ;;  %v129_v5 = vld [vmem:[#allocation5 + $0xd8] sm:$0xff]  ;;  %v126_v6 = vld [vmem:[#allocation5 + $0xc0] sm:$0xff]  ;;  %v127_v7 = vld [vmem:[#allocation5 + $0xc8] sm:$0xff] }
  0x19   :  { %141 = vmatpush.msra.mxu0 %v130_v1  ;;  %v124_v8 = vld [vmem:[#allocation5 + $0xb0] sm:$0xff]  ;;  %v125_v9 = vld [vmem:[#allocation5 + $0xb8] sm:$0xff]  ;;  %v122_v10 = vld [vmem:[#allocation5 + $0xa0] sm:$0xff] }
  0x1a   :  { %161 = vmatpush.msra.mxu1 %v131_v3  ;;  %v123_v11 = vld [vmem:[#allocation5 + $0xa8] sm:$0xff]  ;;  %v120_v12 = vld [vmem:[#allocation5 + $0x90] sm:$0xff]  ;;  %v121_v13 = vld [vmem:[#allocation5 + $0x98] sm:$0xff] }
  0x1b   :  { %142 = vmatpush.msra.mxu0 %v128_v4  ;;  %v212_v14 = vld [vmem:[#allocation8 + $0xf0] sm:$0xff]  ;;  %v210_v15 = vld [vmem:[#allocation8 + $0xe0] sm:$0xff]  ;;  %v101_v51 = vld [vmem:[#allocation2] sm:$0x3] }
  0x1c   :  { %162 = vmatpush.msra.mxu1 %v129_v5  ;;  %v118_v16 = vld [vmem:[#allocation5 + $0x80] sm:$0xff]  ;;  %v119_v17 = vld [vmem:[#allocation5 + $0x88] sm:$0xff]  ;;  %252 = vmatpush.msra.mxu2 %v212_v14  ;;  %v244_v18 = vld [vmem:[#allocation8 + $0x1f0] sm:$0xff] }
  0x1d   :  { %143 = vmatpush.msra.mxu0 %v126_v6  ;;  %v208_v19 = vld [vmem:[#allocation8 + $0xd0] sm:$0xff]  ;;  %v242_v20 = vld [vmem:[#allocation8 + $0x1e0] sm:$0xff]  ;;  %272 = vmatpush.msra.mxu3 %v244_v18  ;;  %v213_v52 = vld [vmem:[#allocation8 + $0xf8] sm:$0xff] }
  0x1e   :  { %163 = vmatpush.msra.mxu1 %v127_v7  ;;  %v116_v21 = vld [vmem:[#allocation5 + $0x70] sm:$0xff]  ;;  %v117_v22 = vld [vmem:[#allocation5 + $0x78] sm:$0xff]  ;;  %253 = vmatpush.msra.mxu2 %v210_v15  ;;  %v206_v23 = vld [vmem:[#allocation8 + $0xc0] sm:$0xff] }
  0x1f   :  { %144 = vmatpush.msra.mxu0 %v124_v8  ;;  %v240_v24 = vld [vmem:[#allocation8 + $0x1d0] sm:$0xff]  ;;  %v114_v25 = vld [vmem:[#allocation5 + $0x60] sm:$0xff]  ;;  %v115_v26 = vld [vmem:[#allocation5 + $0x68] sm:$0xff]  ;;  %273 = vmatpush.msra.mxu3 %v242_v20 }
  0x20   :  { %164 = vmatpush.msra.mxu1 %v125_v9  ;;  %254 = vmatpush.msra.mxu2 %v208_v19  ;;  %v204_v27 = vld [vmem:[#allocation8 + $0xb0] sm:$0xff]  ;;  %v238_v28 = vld [vmem:[#allocation8 + $0x1c0] sm:$0xff]  ;;  %v245_v53 = vld [vmem:[#allocation8 + $0x1f8] sm:$0xff] }
  0x21   :  { %145 = vmatpush.msra.mxu0 %v122_v10  ;;  %v112_v29 = vld [vmem:[#allocation5 + $0x50] sm:$0xff]  ;;  %v113_v30 = vld [vmem:[#allocation5 + $0x58] sm:$0xff]  ;;  %274 = vmatpush.msra.mxu3 %v240_v24  ;;  %v202_v31 = vld [vmem:[#allocation8 + $0xa0] sm:$0xff] }
  0x22   :  { %165 = vmatpush.msra.mxu1 %v123_v11  ;;  %255 = vmatpush.msra.mxu2 %v206_v23  ;;  %v236_v32 = vld [vmem:[#allocation8 + $0x1b0] sm:$0xff]  ;;  %v110_v33 = vld [vmem:[#allocation5 + $0x40] sm:$0xff]  ;;  %v111_v34 = vld [vmem:[#allocation5 + $0x48] sm:$0xff] }
  0x23   :  { %146 = vmatpush.msra.mxu0 %v120_v12  ;;  %275 = vmatpush.msra.mxu3 %v238_v28  ;;  %v200_v35 = vld [vmem:[#allocation8 + $0x90] sm:$0xff]  ;;  %v234_v36 = vld [vmem:[#allocation8 + $0x1a0] sm:$0xff]  ;;  %v211_v56 = vld [vmem:[#allocation8 + $0xe8] sm:$0xff] }
  0x24   :  { %166 = vmatpush.msra.mxu1 %v121_v13  ;;  %256 = vmatpush.msra.mxu2 %v204_v27  ;;  %v108_v37 = vld [vmem:[#allocation5 + $0x30] sm:$0xff]  ;;  %v109_v38 = vld [vmem:[#allocation5 + $0x38] sm:$0xff]  ;;  %v198_v39 = vld [vmem:[#allocation8 + $0x80] sm:$0xff] }
  0x25   :  { %147 = vmatpush.msra.mxu0 %v118_v16  ;;  %276 = vmatpush.msra.mxu3 %v236_v32  ;;  %v232_v40 = vld [vmem:[#allocation8 + $0x190] sm:$0xff]  ;;  %v106_v41 = vld [vmem:[#allocation5 + $0x20] sm:$0xff]  ;;  %v107_v42 = vld [vmem:[#allocation5 + $0x28] sm:$0xff] }
  0x26   :  { %167 = vmatpush.msra.mxu1 %v119_v17  ;;  %257 = vmatpush.msra.mxu2 %v202_v31  ;;  %v196_v43 = vld [vmem:[#allocation8 + $0x70] sm:$0xff]  ;;  %v230_v44 = vld [vmem:[#allocation8 + $0x180] sm:$0xff]  ;;  %v243_v57 = vld [vmem:[#allocation8 + $0x1e8] sm:$0xff] }
  0x27   :  { %148 = vmatpush.msra.mxu0 %v116_v21  ;;  %277 = vmatpush.msra.mxu3 %v234_v36  ;;  %v104_v45 = vld [vmem:[#allocation5 + $0x10] sm:$0xff]  ;;  %v105_v46 = vld [vmem:[#allocation5 + $0x18] sm:$0xff]  ;;  %v194_v47 = vld [vmem:[#allocation8 + $0x60] sm:$0xff] }
  0x28   :  { %168 = vmatpush.msra.mxu1 %v117_v22  ;;  %258 = vmatpush.msra.mxu2 %v200_v35  ;;  %v228_v48 = vld [vmem:[#allocation8 + $0x170] sm:$0xff]  ;;  %v102_v49 = vld [vmem:[#allocation5] sm:$0xff]  ;;  %v103_v50 = vld [vmem:[#allocation5 + $0x8] sm:$0xff] }
  0x29   :  { %149 = vmatpush.msra.mxu0 %v114_v25  ;;  %278 = vmatpush.msra.mxu3 %v232_v40  ;;  %v192_v54 = vld [vmem:[#allocation8 + $0x50] sm:$0xff]  ;;  %v226_v55 = vld [vmem:[#allocation8 + $0x160] sm:$0xff]  ;;  %v209_v60 = vld [vmem:[#allocation8 + $0xd8] sm:$0xff] }
  0x2a   :  { %169 = vmatpush.msra.mxu1 %v115_v26  ;;  %259 = vmatpush.msra.mxu2 %v198_v39  ;;  %v190_v58 = vld [vmem:[#allocation8 + $0x40] sm:$0xff]  ;;  %v224_v59 = vld [vmem:[#allocation8 + $0x150] sm:$0xff]  ;;  %v241_v61 = vld [vmem:[#allocation8 + $0x1d8] sm:$0xff] }
  0x2b   :  { %150 = vmatpush.msra.mxu0 %v112_v29  ;;  %279 = vmatpush.msra.mxu3 %v230_v44  ;;  %v188_v62 = vld [vmem:[#allocation8 + $0x30] sm:$0xff]  ;;  %v222_v63 = vld [vmem:[#allocation8 + $0x140] sm:$0xff]  ;;  %v207_v0 = vld [vmem:[#allocation8 + $0xc8] sm:$0xff] }
  0x2c   :  { %170 = vmatpush.msra.mxu1 %v113_v30  ;;  %260 = vmatpush.msra.mxu2 %v196_v43  ;;  %v239_v1 = vld [vmem:[#allocation8 + $0x1c8] sm:$0xff]  ;;  %v205_v2 = vld [vmem:[#allocation8 + $0xb8] sm:$0xff]  ;;  %v186_v19 = vld [vmem:[#allocation8 + $0x20] sm:$0xff] }
  0x2d   :  { %151 = vmatpush.msra.mxu0 %v110_v33  ;;  %280 = vmatpush.msra.mxu3 %v228_v48  ;;  %v237_v3 = vld [vmem:[#allocation8 + $0x1b8] sm:$0xff]  ;;  %v203_v4 = vld [vmem:[#allocation8 + $0xa8] sm:$0xff]  ;;  %v220_v20 = vld [vmem:[#allocation8 + $0x130] sm:$0xff] }
  0x2e   :  { %171 = vmatpush.msra.mxu1 %v111_v34  ;;  %261 = vmatpush.msra.mxu2 %v194_v47  ;;  %v235_v5 = vld [vmem:[#allocation8 + $0x1a8] sm:$0xff]  ;;  %v201_v6 = vld [vmem:[#allocation8 + $0x98] sm:$0xff]  ;;  %v184_v23 = vld [vmem:[#allocation8 + $0x10] sm:$0xff] }
  0x2f   :  { %152 = vmatpush.msra.mxu0 %v108_v37  ;;  %281 = vmatpush.msra.mxu3 %v226_v55  ;;  %v233_v7 = vld [vmem:[#allocation8 + $0x198] sm:$0xff]  ;;  %v199_v8 = vld [vmem:[#allocation8 + $0x88] sm:$0xff]  ;;  %v218_v24 = vld [vmem:[#allocation8 + $0x120] sm:$0xff] }
  0x30   :  { %172 = vmatpush.msra.mxu1 %v109_v38  ;;  %262 = vmatpush.msra.mxu2 %v192_v54  ;;  %v231_v9 = vld [vmem:[#allocation8 + $0x188] sm:$0xff]  ;;  %v197_v10 = vld [vmem:[#allocation8 + $0x78] sm:$0xff]  ;;  %v182_v27 = vld [vmem:[#allocation8] sm:$0xff] }
  0x31   :  { %153 = vmatpush.msra.mxu0 %v106_v41  ;;  %282 = vmatpush.msra.mxu3 %v224_v59  ;;  %v229_v11 = vld [vmem:[#allocation8 + $0x178] sm:$0xff]  ;;  %v195_v12 = vld [vmem:[#allocation8 + $0x68] sm:$0xff]  ;;  %v216_v28 = vld [vmem:[#allocation8 + $0x110] sm:$0xff] }
  0x32   :  { %173 = vmatpush.msra.mxu1 %v107_v42  ;;  %263 = vmatpush.msra.mxu2 %v190_v58  ;;  %v227_v13 = vld [vmem:[#allocation8 + $0x168] sm:$0xff]  ;;  %v193_v14 = vld [vmem:[#allocation8 + $0x58] sm:$0xff]  ;;  %v214_v31 = vld [vmem:[#allocation8 + $0x100] sm:$0xff] }
  0x33   :  { %154 = vmatpush.msra.mxu0 %v104_v45  ;;  %283 = vmatpush.msra.mxu3 %v222_v63  ;;  %v225_v15 = vld [vmem:[#allocation8 + $0x158] sm:$0xff]  ;;  %v191_v16 = vld [vmem:[#allocation8 + $0x48] sm:$0xff]  ;;  %v364_v34 = vld [vmem:[#allocation10 + $0xf0] sm:$0xff] }
  0x34   :  { %174 = vmatpush.msra.mxu1 %v105_v46  ;;  %264 = vmatpush.msra.mxu2 %v188_v62  ;;  %v223_v17 = vld [vmem:[#allocation8 + $0x148] sm:$0xff]  ;;  %v189_v18 = vld [vmem:[#allocation8 + $0x38] sm:$0xff]  ;;  %v348_v36 = vld [vmem:[#allocation10 + $0x70] sm:$0xff] }
  0x35   :  { %155 = vmatpush.msra.mxu0 %v102_v49  ;;  %v187_v21 = vld [vmem:[#allocation8 + $0x28] sm:$0xff]  ;;  %284 = vmatpush.msra.mxu3 %v220_v20  ;;  %v221_v22 = vld [vmem:[#allocation8 + $0x138] sm:$0xff]  ;;  %v362_v39 = vld [vmem:[#allocation10 + $0xe0] sm:$0xff] }
  0x36   :  { %175 = vmatpush.msra.mxu1 %v103_v50  ;;  %156 = vmatmul.f32.vlgmr.msra.gmra.mxu0 %v101_v51  ;;  %v185_v25 = vld [vmem:[#allocation8 + $0x18] sm:$0xff]  ;;  %v219_v26 = vld [vmem:[#allocation8 + $0x128] sm:$0xff]  ;;  %v346_v40 = vld [vmem:[#allocation10 + $0x60] sm:$0xff] }
  0x37   :  { %176 = vmatmul.f32.vlgmr.msra.gmra.mxu1 %v101_v51  ;;  %292 = vmatpush.msrb.mxu0 %v213_v52  ;;  %v183_v29 = vld [vmem:[#allocation8 + $0x8] sm:$0xff]  ;;  %v217_v30 = vld [vmem:[#allocation8 + $0x118] sm:$0xff]  ;;  %v360_v43 = vld [vmem:[#allocation10 + $0xd0] sm:$0xff] }
  0x38   :  { %312 = vmatpush.msrb.mxu1 %v245_v53  ;;  %265 = vmatpush.msra.mxu2 %v186_v19  ;;  %v215_v32 = vld [vmem:[#allocation8 + $0x108] sm:$0xff]  ;;  %v365_v33 = vld [vmem:[#allocation10 + $0xf8] sm:$0xff]  ;;  %v344_v44 = vld [vmem:[#allocation10 + $0x50] sm:$0xff] }
  0x39   :  { %293 = vmatpush.msrb.mxu0 %v211_v56  ;;  %285 = vmatpush.msra.mxu3 %v218_v24  ;;  %v349_v35 = vld [vmem:[#allocation10 + $0x78] sm:$0xff]  ;;  %v363_v37 = vld [vmem:[#allocation10 + $0xe8] sm:$0xff]  ;;  %v358_v47 = vld [vmem:[#allocation10 + $0xc0] sm:$0xff] }
  0x3a   :  { %313 = vmatpush.msrb.mxu1 %v243_v57  ;;  %266 = vmatpush.msra.mxu2 %v184_v23  ;;  %v347_v38 = vld [vmem:[#allocation10 + $0x68] sm:$0xff]  ;;  %v361_v41 = vld [vmem:[#allocation10 + $0xd8] sm:$0xff]  ;;  %v342_v48 = vld [vmem:[#allocation10 + $0x40] sm:$0xff] }
  0x3b   :  { %294 = vmatpush.msrb.mxu0 %v209_v60  ;;  %286 = vmatpush.msra.mxu3 %v216_v28  ;;  %v345_v42 = vld [vmem:[#allocation10 + $0x58] sm:$0xff]  ;;  %v359_v45 = vld [vmem:[#allocation10 + $0xc8] sm:$0xff]  ;;  %v356_v51 = vld [vmem:[#allocation10 + $0xb0] sm:$0xff] }
  0x3c   :  { %314 = vmatpush.msrb.mxu1 %v241_v61  ;;  %267 = vmatpush.msra.mxu2 %v182_v27  ;;  %v343_v46 = vld [vmem:[#allocation10 + $0x48] sm:$0xff]  ;;  %v357_v49 = vld [vmem:[#allocation10 + $0xb8] sm:$0xff]  ;;  %v354_v54 = vld [vmem:[#allocation10 + $0xa0] sm:$0xff] }
  0x3d   :  { %295 = vmatpush.msrb.mxu0 %v207_v0  ;;  %287 = vmatpush.msra.mxu3 %v214_v31  ;;  %v341_v50 = vld [vmem:[#allocation10 + $0x38] sm:$0xff]  ;;  %v355_v52 = vld [vmem:[#allocation10 + $0xa8] sm:$0xff]  ;;  %v340_v63 = vld [vmem:[#allocation10 + $0x30] sm:$0xff] }
  0x3e   :  { %315 = vmatpush.msrb.mxu1 %v239_v1  ;;  %370 = vmatpush.msrb.mxu2 %v349_v35  ;;  %v134_v53 = vld [vmem:[#allocation7] sm:$0x3]  ;;  %v339_v1 = vld [vmem:[#allocation10 + $0x28] sm:$0xff]  ;;  %v440_v23 = vld [vmem:[%s673_s6] ss:$0 sm:$0xff] }
  0x3f   :  { %296 = vmatpush.msrb.mxu0 %v205_v2  ;;  %390 = vmatpush.msrb.mxu3 %v365_v33  ;;  %v136_v55 = vperm.slane %v134_v53, 0  ;;  %v137_v56 = vperm.slane %v134_v53, 1  ;;  %v353_v0 = vld [vmem:[#allocation10 + $0x98] sm:$0xff]  ;;  %v352_v2 = vld [vmem:[#allocation10 + $0x90] sm:$0xff] }
  0x40   :  { %316 = vmatpush.msrb.mxu1 %v237_v3  ;;  %371 = vmatpush.msrb.mxu2 %v348_v36  ;;  %v338_v3 = vld [vmem:[#allocation10 + $0x20] sm:$0xff] }
  0x41   :  { %297 = vmatpush.msrb.mxu0 %v203_v4  ;;  %391 = vmatpush.msrb.mxu3 %v364_v34  ;;  %v351_v4 = vld [vmem:[#allocation10 + $0x88] sm:$0xff] }
  0x42   :  { %317 = vmatpush.msrb.mxu1 %v235_v5  ;;  %372 = vmatpush.msrb.mxu2 %v347_v38  ;;  %v337_v5 = vld [vmem:[#allocation10 + $0x18] sm:$0xff] }
  0x43   :  { %298 = vmatpush.msrb.mxu0 %v201_v6  ;;  %392 = vmatpush.msrb.mxu3 %v363_v37  ;;  %v350_v6 = vld [vmem:[#allocation10 + $0x80] sm:$0xff] }
  0x44   :  { %318 = vmatpush.msrb.mxu1 %v233_v7  ;;  %373 = vmatpush.msrb.mxu2 %v346_v40  ;;  %v336_v7 = vld [vmem:[#allocation10 + $0x10] sm:$0xff] }
  0x45   :  { %299 = vmatpush.msrb.mxu0 %v199_v8  ;;  %393 = vmatpush.msrb.mxu3 %v362_v39  ;;  %v335_v8 = vld [vmem:[#allocation10 + $0x8] sm:$0xff] }
  0x46   :  { %319 = vmatpush.msrb.mxu1 %v231_v9  ;;  %374 = vmatpush.msrb.mxu2 %v345_v42  ;;  %v334_v9 = vld [vmem:[#allocation10] sm:$0xff] }
  0x47   :  { %300 = vmatpush.msrb.mxu0 %v197_v10  ;;  %394 = vmatpush.msrb.mxu3 %v361_v41  ;;  %v246_v10 = vld [vmem:[%s671_s4] sm:$0x3]  ;;  %s602_s4 = smov [#allocation11]  }
  0x48   :  { %320 = vmatpush.msrb.mxu1 %v229_v11  ;;  %375 = vmatpush.msrb.mxu2 %v344_v44  ;;  %v249_v11 = vperm.slane %v246_v10, 1  ;;  %s416_s29 = sshll.u32 %s602_s4, 4  ;;  %s417_s29 = int_to_ptr.vmem [resolvable:$true] %s416_s29 }
  0x49   :  { %301 = vmatpush.msrb.mxu0 %v195_v12  ;;  %395 = vmatpush.msrb.mxu3 %v360_v43 }
  0x4a   :  { %321 = vmatpush.msrb.mxu1 %v227_v13  ;;  %376 = vmatpush.msrb.mxu2 %v343_v46 }
  0x4b   :  { %302 = vmatpush.msrb.mxu0 %v193_v14  ;;  %396 = vmatpush.msrb.mxu3 %v359_v45 }
  0x4c   :  { %322 = vmatpush.msrb.mxu1 %v225_v15  ;;  %377 = vmatpush.msrb.mxu2 %v342_v48 }
  0x4d   :  { %303 = vmatpush.msrb.mxu0 %v191_v16  ;;  %397 = vmatpush.msrb.mxu3 %v358_v47  ;;  %v248_v16 = vperm.slane %v246_v10, 0 }
  0x4e   :  { %323 = vmatpush.msrb.mxu1 %v223_v17  ;;  %378 = vmatpush.msrb.mxu2 %v341_v50 }
  0x4f   :  { %304 = vmatpush.msrb.mxu0 %v189_v18  ;;  %398 = vmatpush.msrb.mxu3 %v357_v49 }
  0x50   :  { %324 = vmatpush.msrb.mxu1 %v221_v22  ;;  %379 = vmatpush.msrb.mxu2 %v340_v63 }
  0x51   :  { %305 = vmatpush.msrb.mxu0 %v187_v21  ;;  %399 = vmatpush.msrb.mxu3 %v356_v51 }
  0x52   :  { %325 = vmatpush.msrb.mxu1 %v219_v26  ;;  %380 = vmatpush.msrb.mxu2 %v339_v1 }
  0x53   :  { %306 = vmatpush.msrb.mxu0 %v185_v25  ;;  %400 = vmatpush.msrb.mxu3 %v355_v52 }
  0x54   :  { %326 = vmatpush.msrb.mxu1 %v217_v30  ;;  %381 = vmatpush.msrb.mxu2 %v338_v3 }
  0x55   :  { %307 = vmatpush.msrb.mxu0 %v183_v29  ;;  %401 = vmatpush.msrb.mxu3 %v354_v54 }
  0x56   :  { %327 = vmatpush.msrb.mxu1 %v215_v32  ;;  %382 = vmatpush.msrb.mxu2 %v337_v5 }
  0x57   :  { %402 = vmatpush.msrb.mxu3 %v353_v0 }
  0x58   :  { %383 = vmatpush.msrb.mxu2 %v336_v7 }
  0x59   :  { %403 = vmatpush.msrb.mxu3 %v352_v2 }
  0x5a   :  { %384 = vmatpush.msrb.mxu2 %v335_v8 }
  0x5b   :  { %404 = vmatpush.msrb.mxu3 %v351_v4 }
  0x5c   :  { %385 = vmatpush.msrb.mxu2 %v334_v9 }
  0x5d   :  { %405 = vmatpush.msrb.mxu3 %v350_v6 }
  0xb3   :  { %v157_v57 = vpop.f32.mrf.mxu0 }
  0xb4   :  { %v177_v58 = vpop.f32.mrf.mxu1  ;;  %v158_v59 = vadd.f32 %v157_v57, %v136_v55 }
  0xb5   :  { %v178_v60 = vadd.f32 %v177_v58, %v137_v56 }
  0xb6   :  { %v180_v61 = vmax.f32 %v158_v59, 0.0 }
  0xb7   :  { %v181_v62 = vmax.f32 %v178_v60, 0.0 }
  0xb8   :  { %268 = vmatmul.f32.vlgmr.msra.gmra.mxu2 %v180_v61  ;;  %308 = vmatmul.f32.vlgmr.msrb.gmra.mxu0 %v180_v61 }
  0xb9   :  { %288 = vmatmul.f32.vlgmr.msra.gmra.mxu3 %v181_v62  ;;  %328 = vmatmul.f32.vlgmr.msrb.gmra.mxu1 %v181_v62 }
 0x135   :  { %v309_v12 = vpop.f32.mrf.mxu0 }
 0x136   :  { %v310_v13 = vadd.f32 %v309_v12, %v249_v11  ;;  %v329_v14 = vpop.f32.mrf.mxu1 }
 0x138   :  { %v330_v15 = vadd.f32 %v329_v14, %v310_v13 }
 0x13a   :  { %v333_v17 = vmax.f32 %v330_v15, 0.0 }
 0x13b   :  { %v269_v18 = vpop.f32.mrf.mxu2 }
 0x13c   :  { %v270_v19 = vadd.f32 %v269_v18, %v248_v16  ;;  %406 = vmatmul.f32.vlgmr.msrb.gmra.mxu3 %v333_v17  ;;  %v289_v20 = vpop.f32.mrf.mxu3 }
 0x13e   :  { %v290_v21 = vadd.f32 %v289_v20, %v270_v19 }
 0x140   :  { %v332_v22 = vmax.f32 %v290_v21, 0.0 }
 0x142   :  { %386 = vmatmul.f32.vlgmr.msrb.gmra.mxu2 %v332_v22 }
 0x1bf   :  { %v407_v26 = vpop.f32.mrf.mxu3 }
 0x1c5   :  { %v387_v24 = vpop.f32.mrf.mxu2 }
 0x1c6   :  { %v388_v25 = vadd.f32 %v440_v23, %v387_v24 }
 0x1c8   :  { %v408_v27 = vadd.f32 %v407_v26, %v388_v25 }
 0x1ca   :  { %410 = vst [vmem:[#allocation11] sm:$0x3] %v408_v27 }
 0x1cb   :  { %421 = dma.vmem_to_hbm [thread:$0]  %s417_s29, 32, %s419_s9, [#allocation4]  }
 0x1cc   :  { %591 = dma.done.wait [#allocation4], 32  }
 0x1cd   :  { %592 = vsyncadd [#allocation4], 4294967264 }
 0x1ce   :  { %426 = vsyncpa [#allocation3], 1 }
 0x1cf   :  { %427 = vsyncpa [#allocation6], 1 }
 0x1d0   :  { %428 = vsyncpa [#allocation9], 1 }
 0x1d1   :  { %429 = vsyncpa [#allocation4], 1 }

</bundles_post_ra>
